<compile_context>
chip_gen: v5e
topology: v5e:2x2
jax: 0.10.0
libtpu: 0.0.40
codegen_flags: <defaults>
</compile_context>

<pallas_src>
import functools

import jax
import jax.numpy as jnp
from jax.experimental import pallas as pl
from jax.experimental.pallas import tpu as pltpu


def _round_up(n: int, m: int) -> int:
    return (n + m - 1) // m * m


def _mlp_embedder_kernel(x_ref, w1_ref, b1_ref, w2_ref, b2_ref, o_ref, h_ref,
                         *, reuse_h: bool):
    # x_ref: (TM, IN_P)        w1_ref: (IN_P, HID_P)   b1_ref: (1, HID_P) f32
    # w2_ref: (HID_P, TN)      b2_ref: (1, TN) f32
    # o_ref: (TM, TN)          h_ref (scratch): (TM, HID_P) in weight dtype
    def _first_layer():
        h = jnp.dot(x_ref[...], w1_ref[...], preferred_element_type=jnp.float32)
        h = h + b1_ref[...]                  # biases pre-cast to f32
        return h * jax.nn.sigmoid(h)         # SiLU (sigmoid -> EUP)

    if reuse_h:
        # Compute h once per row tile (j == 0) and reuse across column tiles.
        @pl.when(pl.program_id(1) == 0)
        def _():
            h_ref[...] = _first_layer().astype(h_ref.dtype)

        h = h_ref[...]
    else:
        # Tiny-M path: recompute h per column tile so the j axis can be "parallel".
        h = _first_layer().astype(w2_ref.dtype)

    y = jnp.dot(h, w2_ref[...], preferred_element_type=jnp.float32)
    o_ref[...] = (y + b2_ref[...]).astype(o_ref.dtype)


def prepare_mlp_embedder_params(w1, b1, w2, b2, *, param_dtype=jnp.bfloat16):
    """One-time parameter prep (do at load time, NOT per forward call).

    w1: (hidden, in_dim), b1: (hidden,), w2: (hidden, hidden), b2: (hidden,)
    Transposes to (in, out), lane-pads to multiples of 128, casts weights to
    `param_dtype` (bf16 by default: the kernel is weight-streaming / HBM-bound
    at Flux scale and accumulation stays f32) and biases to f32.
    Zero padding is exact: padded input cols / hidden channels contribute 0.
    """
    hidden, in_dim = w1.shape
    in_p = _round_up(in_dim, 128)
    hid_p = _round_up(hidden, 128)

    w1_p = jnp.pad(jnp.transpose(w1),
                   ((0, in_p - in_dim), (0, hid_p - hidden))).astype(param_dtype)
    w2_p = jnp.pad(jnp.transpose(w2),
                   ((0, hid_p - hidden), (0, hid_p - hidden))).astype(param_dtype)
    b1_p = jnp.pad(b1, (0, hid_p - hidden)).reshape(1, hid_p).astype(jnp.float32)
    b2_p = jnp.pad(b2, (0, hid_p - hidden)).reshape(1, hid_p).astype(jnp.float32)
    return (w1_p, b1_p, w2_p, b2_p, in_dim, hidden)


def mlp_embedder(x, prepared, *, tm=256, tn=512):
    """x: (..., in_dim). prepared: output of prepare_mlp_embedder_params."""
    w1_p, b1_p, w2_p, b2_p, in_dim, hidden = prepared
    in_p, hid_p = w1_p.shape
    assert x.shape[-1] == in_dim, "last dim of x must equal in_dim"
    out_dtype = x.dtype

    lead = x.shape[:-1]
    M = 1
    for d in lead:
        M *= d

    x2d = x.reshape(M, in_dim)
    # Feed the MXU in the weight dtype (e.g. f32 activations -> bf16).
    if jnp.dtype(w1_p.dtype).itemsize < jnp.dtype(x2d.dtype).itemsize:
        x2d = x2d.astype(w1_p.dtype)

    # Pad rows only to a sublane multiple (<=7 rows); partial boundary row
    # tiles are handled by Pallas' masked boundary blocks (no pad to tm).
    M8 = _round_up(max(M, 1), 8)
    pad_rows, pad_cols = M8 - M, in_p - in_dim
    if pad_rows or pad_cols:
        x2d = jnp.pad(x2d, ((0, pad_rows), (0, pad_cols)))

    # Row tile: single tile for small M, otherwise a multiple of 128 (MXU rows).
    tm = max(8, _round_up(tm, 8))
    if M8 <= tm:
        tm_eff = M8
    else:
        tm_eff = min(M8, max(128, (tm // 128) * 128))
    grid_i = pl.cdiv(M8, tm_eff)

    # Column tile over W2's output columns: multiple of 128 that divides hid_p.
    tn_eff = (min(_round_up(tn, 128), hid_p) // 128) * 128
    while hid_p % tn_eff:
        tn_eff -= 128
    grid_j = hid_p // tn_eff

    # Reuse h across column tiles unless there is a single row tile with
    # multiple column tiles (then recompute h so j can be megacore-parallel).
    reuse_h = (grid_i > 1) or (grid_j == 1)
    dims = ("parallel", "arbitrary") if reuse_h else ("parallel", "parallel")

    # VMEM budget: generation-aware cap (75% of physical), always set.
    wbytes = jnp.dtype(w1_p.dtype).itemsize
    abytes = jnp.dtype(x2d.dtype).itemsize
    obytes = jnp.dtype(out_dtype).itemsize
    vmem_need = (
        in_p * hid_p * wbytes            # W1 (resident, single-buffered)
        + hid_p * 4                      # b1
        + 2 * hid_p * tn_eff * wbytes    # W2 column tiles (double-buffered)
        + 2 * tn_eff * 4                 # b2
        + 2 * tm_eff * in_p * abytes     # x tiles
        + 2 * tm_eff * tn_eff * obytes   # out tiles
        + tm_eff * hid_p * wbytes        # h scratch
        + tm_eff * hid_p * 4             # f32 first-matmul intermediate
    )
    vmem_need = int(1.25 * vmem_need) + (2 << 20)
    try:
        vmem_cap = int(pltpu.get_tpu_info().vmem_capacity_bytes)
    except Exception:
        vmem_cap = 64 << 20
    vmem_cap = (vmem_cap * 3) // 4       # headroom for Mosaic internal scratch
    vmem_limit = int(max(min(vmem_need, vmem_cap), 32 << 20))

    kernel = functools.partial(_mlp_embedder_kernel, reuse_h=reuse_h)
    out_shape = jax.ShapeDtypeStruct((M8, hid_p), out_dtype)

    def _run(weight_pipeline_mode):
        wkw = ({} if weight_pipeline_mode is None
               else {"pipeline_mode": weight_pipeline_mode})
        grid_spec = pltpu.PrefetchScalarGridSpec(
            num_scalar_prefetch=0,
            grid=(grid_i, grid_j),
            in_specs=[
                pl.BlockSpec((tm_eff, in_p), lambda i, j: (i, 0)),        # x rows
                pl.BlockSpec((in_p, hid_p), lambda i, j: (0, 0), **wkw),  # W1 resident
                pl.BlockSpec((1, hid_p), lambda i, j: (0, 0), **wkw),     # b1 resident
                pl.BlockSpec((hid_p, tn_eff), lambda i, j: (0, j)),       # W2 col tile
                pl.BlockSpec((1, tn_eff), lambda i, j: (0, j)),           # b2 col tile
            ],
            out_specs=pl.BlockSpec((tm_eff, tn_eff), lambda i, j: (i, j)),
            scratch_shapes=[pltpu.VMEM((tm_eff, hid_p), w2_p.dtype)],
        )
        return pl.pallas_call(
            kernel,
            out_shape=out_shape,
            grid_spec=grid_spec,
            compiler_params=pltpu.CompilerParams(
                dimension_semantics=dims,
                vmem_limit_bytes=vmem_limit,
            ),
        )(x2d, w1_p, b1_p, w2_p, b2_p)

    try:
        # Resident blocks never change -> single-buffer them (halves weight VMEM).
        out2d = _run(pl.Buffered(1))
    except Exception:
        # Fallback if this jax version rejects Buffered(1) for these blocks.
        out2d = _run(None)

    if M8 != M or hid_p != hidden:
        out2d = out2d[:M, :hidden]
    return out2d.reshape(*lead, hidden)


if __name__ == "__main__":
    # Small shapes consistent with the module: batch=2, seq=8, in_dim=32, hidden=64.
    B, S, IN_DIM, HIDDEN = 2, 8, 32, 64
    key = jax.random.PRNGKey(0)
    kx, kw1, kb1, kw2, kb2 = jax.random.split(key, 5)

    x = jax.random.normal(kx, (B, S, IN_DIM), dtype=jnp.float32)
    # PyTorch Linear weight layout: (out_features, in_features).
    w1 = jax.random.normal(kw1, (HIDDEN, IN_DIM), dtype=jnp.float32) * 0.05
    b1 = jax.random.normal(kb1, (HIDDEN,), dtype=jnp.float32) * 0.05
    w2 = jax.random.normal(kw2, (HIDDEN, HIDDEN), dtype=jnp.float32) * 0.05
    b2 = jax.random.normal(kb2, (HIDDEN,), dtype=jnp.float32) * 0.05

    # One-time prep: transpose + lane-pad + bf16 weights / f32 biases.
    prepared = prepare_mlp_embedder_params(w1, b1, w2, b2)

    out = jax.block_until_ready(mlp_embedder(x, prepared))

    # Pure-JAX reference mirroring the kernel's bf16-input / f32-accumulate path.
    xb = x.astype(jnp.bfloat16).astype(jnp.float32)
    w1b = w1.astype(jnp.bfloat16).astype(jnp.float32)
    w2b = w2.astype(jnp.bfloat16).astype(jnp.float32)
    h_ref = xb @ w1b.T + b1
    h_ref = h_ref * jax.nn.sigmoid(h_ref)
    h_ref = h_ref.astype(jnp.bfloat16).astype(jnp.float32)
    ref = h_ref @ w2b.T + b2

    assert out.shape == (B, S, HIDDEN)
    assert out.dtype == x.dtype
    assert jnp.allclose(out, ref, atol=1e-2, rtol=1e-2), float(
        jnp.max(jnp.abs(out - ref)))

    print("KERNEL_OK")
</pallas_src>

<mosaic_0001>
module attributes {stable_mosaic.version = 11 : i64} {
  func.func @_mlp_embedder_kernel(%arg0: i32, %arg1: i32, %arg2: memref<16x128xbf16, #tpu.memory_space<vmem>>, %arg3: memref<128x128xbf16, #tpu.memory_space<vmem>>, %arg4: memref<1x128xf32, #tpu.memory_space<vmem>>, %arg5: memref<128x128xbf16, #tpu.memory_space<vmem>>, %arg6: memref<1x128xf32, #tpu.memory_space<vmem>>, %arg7: memref<16x128xf32, #tpu.memory_space<vmem>>, %arg8: memref<16x128xbf16, #tpu.memory_space<vmem>>) attributes {dimension_semantics = [#tpu.dimension_semantics<parallel>, #tpu.dimension_semantics<arbitrary>], iteration_bounds = array<i64: 1, 1>, scalar_prefetch = 0 : i64, scratch_operands = 1 : i64, tpu.core_type = #tpu.core_type<tc>, window_params = [{transform_indices = @transform_0, window_bounds = array<i64: 16, 128>}, {pipeline_mode = #tpu.pipeline_mode<synchronous>, transform_indices = @transform_1, window_bounds = array<i64: 128, 128>}, {pipeline_mode = #tpu.pipeline_mode<synchronous>, transform_indices = @transform_2, window_bounds = array<i64: 1, 128>}, {transform_indices = @transform_3, window_bounds = array<i64: 128, 128>}, {transform_indices = @transform_4, window_bounds = array<i64: 1, 128>}, {transform_indices = @transform_5, window_bounds = array<i64: 16, 128>}]} {
    %c0_i32 = arith.constant 0 : i32
    %0 = arith.cmpi eq, %arg1, %c0_i32 : i32
    %1 = arith.extui %0 : i1 to i32
    %c0_i32_0 = arith.constant 0 : i32
    %2 = arith.cmpi ne, %1, %c0_i32_0 : i32
    scf.if %2 {
      %c0_8 = arith.constant 0 : index
      %c0_9 = arith.constant 0 : index
      %10 = vector.load %arg2[%c0_8, %c0_9] : memref<16x128xbf16, #tpu.memory_space<vmem>>, vector<16x128xbf16>
      %c0_10 = arith.constant 0 : index
      %c0_11 = arith.constant 0 : index
      %11 = vector.load %arg3[%c0_10, %c0_11] : memref<128x128xbf16, #tpu.memory_space<vmem>>, vector<128x128xbf16>
      %cst_12 = arith.constant dense<0.000000e+00> : vector<16x128xf32>
      %12 = tpu.matmul %10, %11, %cst_12 {dimension_numbers = #tpu.dot_dimension_numbers<[1], [0], [0], [1], [0, 0, 1, 1], [], []>} : vector<16x128xbf16>, vector<128x128xbf16>, vector<16x128xf32> -> vector<16x128xf32>
      %c0_13 = arith.constant 0 : index
      %c0_14 = arith.constant 0 : index
      %13 = vector.load %arg4[%c0_13, %c0_14] : memref<1x128xf32, #tpu.memory_space<vmem>>, vector<1x128xf32>
      %14 = vector.broadcast %13 : vector<1x128xf32> to vector<16x128xf32>
      %15 = arith.addf %12, %14 : vector<16x128xf32>
      %16 = arith.negf %15 : vector<16x128xf32>
      %17 = math.exp %16 : vector<16x128xf32>
      %cst_15 = arith.constant 1.000000e+00 : f32
      %18 = vector.broadcast %cst_15 : f32 to vector<16x128xf32>
      %19 = arith.addf %18, %17 : vector<16x128xf32>
      %20 = arith.divf %18, %19 : vector<16x128xf32>
      %21 = arith.mulf %15, %20 : vector<16x128xf32>
      %22 = arith.truncf %21 : vector<16x128xf32> to vector<16x128xbf16>
      %c0_16 = arith.constant 0 : index
      %c0_17 = arith.constant 0 : index
      %23 = vector.load %arg8[%c0_16, %c0_17] : memref<16x128xbf16, #tpu.memory_space<vmem>>, vector<16x128xbf16>
      tpu.vector_store %arg8[%c0_16, %c0_17], %22 {strides = array<i32>} : memref<16x128xbf16, #tpu.memory_space<vmem>>, vector<16x128xbf16>,
    } else {
    }
    %c0 = arith.constant 0 : index
    %c0_1 = arith.constant 0 : index
    %3 = vector.load %arg8[%c0, %c0_1] : memref<16x128xbf16, #tpu.memory_space<vmem>>, vector<16x128xbf16>
    %c0_2 = arith.constant 0 : index
    %c0_3 = arith.constant 0 : index
    %4 = vector.load %arg5[%c0_2, %c0_3] : memref<128x128xbf16, #tpu.memory_space<vmem>>, vector<128x128xbf16>
    %cst = arith.constant dense<0.000000e+00> : vector<16x128xf32>
    %5 = tpu.matmul %3, %4, %cst {dimension_numbers = #tpu.dot_dimension_numbers<[1], [0], [0], [1], [0, 0, 1, 1], [], []>} : vector<16x128xbf16>, vector<128x128xbf16>, vector<16x128xf32> -> vector<16x128xf32>
    %c0_4 = arith.constant 0 : index
    %c0_5 = arith.constant 0 : index
    %6 = vector.load %arg6[%c0_4, %c0_5] : memref<1x128xf32, #tpu.memory_space<vmem>>, vector<1x128xf32>
    %7 = vector.broadcast %6 : vector<1x128xf32> to vector<16x128xf32>
    %8 = arith.addf %5, %7 : vector<16x128xf32>
    %c0_6 = arith.constant 0 : index
    %c0_7 = arith.constant 0 : index
    %9 = vector.load %arg7[%c0_6, %c0_7] : memref<16x128xf32, #tpu.memory_space<vmem>>, vector<16x128xf32>
    tpu.vector_store %arg7[%c0_6, %c0_7], %8 {strides = array<i32>} : memref<16x128xf32, #tpu.memory_space<vmem>>, vector<16x128xf32>,
    return
  }
  func.func @transform_0(%arg0: i32, %arg1: i32) -> (i32, i32) {
    %c0_i32 = arith.constant 0 : i32
    %c0_i32_0 = arith.constant 0 : i32
    return %arg0, %c0_i32 : i32, i32
  }
  func.func @transform_1(%arg0: i32, %arg1: i32) -> (i32, i32) {
    %c0_i32 = arith.constant 0 : i32
    %c0_i32_0 = arith.constant 0 : i32
    %c0_i32_1 = arith.constant 0 : i32
    return %c0_i32, %c0_i32_0 : i32, i32
  }
  func.func @transform_2(%arg0: i32, %arg1: i32) -> (i32, i32) {
    %c0_i32 = arith.constant 0 : i32
    %c0_i32_0 = arith.constant 0 : i32
    %c0_i32_1 = arith.constant 0 : i32
    return %c0_i32, %c0_i32_0 : i32, i32
  }
  func.func @transform_3(%arg0: i32, %arg1: i32) -> (i32, i32) {
    %c0_i32 = arith.constant 0 : i32
    %c0_i32_0 = arith.constant 0 : i32
    return %c0_i32, %arg1 : i32, i32
  }
  func.func @transform_4(%arg0: i32, %arg1: i32) -> (i32, i32) {
    %c0_i32 = arith.constant 0 : i32
    %c0_i32_0 = arith.constant 0 : i32
    return %c0_i32, %arg1 : i32, i32
  }
  func.func @transform_5(%arg0: i32, %arg1: i32) -> (i32, i32) {
    %c0_i32 = arith.constant 0 : i32
    return %arg0, %arg1 : i32, i32
  }
}

module attributes {stable_mosaic.version = 11 : i64} {
  func.func @_mlp_embedder_kernel(%arg0: i32, %arg1: i32, %arg2: memref<16x128xbf16, #tpu.memory_space<vmem>>, %arg3: memref<128x128xbf16, #tpu.memory_space<vmem>>, %arg4: memref<1x128xf32, #tpu.memory_space<vmem>>, %arg5: memref<128x128xbf16, #tpu.memory_space<vmem>>, %arg6: memref<1x128xf32, #tpu.memory_space<vmem>>, %arg7: memref<16x128xf32, #tpu.memory_space<vmem>>, %arg8: memref<16x128xbf16, #tpu.memory_space<vmem>>) attributes {dimension_semantics = [#tpu.dimension_semantics<parallel>, #tpu.dimension_semantics<arbitrary>], iteration_bounds = array<i64: 1, 1>, scalar_prefetch = 0 : i64, scratch_operands = 1 : i64, tpu.core_type = #tpu.core_type<tc>, window_params = [{transform_indices = @transform_0, window_bounds = array<i64: 16, 128>}, {pipeline_mode = #tpu.pipeline_mode<synchronous>, transform_indices = @transform_1, window_bounds = array<i64: 128, 128>}, {pipeline_mode = #tpu.pipeline_mode<synchronous>, transform_indices = @transform_2, window_bounds = array<i64: 1, 128>}, {transform_indices = @transform_3, window_bounds = array<i64: 128, 128>}, {transform_indices = @transform_4, window_bounds = array<i64: 1, 128>}, {transform_indices = @transform_5, window_bounds = array<i64: 16, 128>}]} {
    %c0_i32 = arith.constant 0 : i32
    %0 = arith.cmpi eq, %arg1, %c0_i32 : i32
    %1 = arith.extui %0 : i1 to i32
    %c0_i32_0 = arith.constant 0 : i32
    %2 = arith.cmpi ne, %1, %c0_i32_0 : i32
    scf.if %2 {
      %c0_8 = arith.constant 0 : index
      %c0_9 = arith.constant 0 : index
      %10 = vector.load %arg2[%c0_8, %c0_9] : memref<16x128xbf16, #tpu.memory_space<vmem>>, vector<16x128xbf16>
      %c0_10 = arith.constant 0 : index
      %c0_11 = arith.constant 0 : index
      %11 = vector.load %arg3[%c0_10, %c0_11] : memref<128x128xbf16, #tpu.memory_space<vmem>>, vector<128x128xbf16>
      %cst_12 = arith.constant dense<0.000000e+00> : vector<16x128xf32>
      %12 = tpu.matmul %10, %11, %cst_12 {dimension_numbers = #tpu.dot_dimension_numbers<[1], [0], [0], [1], [0, 0, 1, 1], [], []>} : vector<16x128xbf16>, vector<128x128xbf16>, vector<16x128xf32> -> vector<16x128xf32>
      %c0_13 = arith.constant 0 : index
      %c0_14 = arith.constant 0 : index
      %13 = vector.load %arg4[%c0_13, %c0_14] : memref<1x128xf32, #tpu.memory_space<vmem>>, vector<1x128xf32>
      %14 = vector.broadcast %13 : vector<1x128xf32> to vector<16x128xf32>
      %15 = arith.addf %12, %14 : vector<16x128xf32>
      %16 = arith.negf %15 : vector<16x128xf32>
      %17 = math.exp %16 : vector<16x128xf32>
      %cst_15 = arith.constant 1.000000e+00 : f32
      %18 = vector.broadcast %cst_15 : f32 to vector<16x128xf32>
      %19 = arith.addf %18, %17 : vector<16x128xf32>
      %20 = arith.divf %18, %19 : vector<16x128xf32>
      %21 = arith.mulf %15, %20 : vector<16x128xf32>
      %22 = arith.truncf %21 : vector<16x128xf32> to vector<16x128xbf16>
      %c0_16 = arith.constant 0 : index
      %c0_17 = arith.constant 0 : index
      %23 = vector.load %arg8[%c0_16, %c0_17] : memref<16x128xbf16, #tpu.memory_space<vmem>>, vector<16x128xbf16>
      tpu.vector_store %arg8[%c0_16, %c0_17], %22 {strides = array<i32>} : memref<16x128xbf16, #tpu.memory_space<vmem>>, vector<16x128xbf16>,
    } else {
    }
    %c0 = arith.constant 0 : index
    %c0_1 = arith.constant 0 : index
    %3 = vector.load %arg8[%c0, %c0_1] : memref<16x128xbf16, #tpu.memory_space<vmem>>, vector<16x128xbf16>
    %c0_2 = arith.constant 0 : index
    %c0_3 = arith.constant 0 : index
    %4 = vector.load %arg5[%c0_2, %c0_3] : memref<128x128xbf16, #tpu.memory_space<vmem>>, vector<128x128xbf16>
    %cst = arith.constant dense<0.000000e+00> : vector<16x128xf32>
    %5 = tpu.matmul %3, %4, %cst {dimension_numbers = #tpu.dot_dimension_numbers<[1], [0], [0], [1], [0, 0, 1, 1], [], []>} : vector<16x128xbf16>, vector<128x128xbf16>, vector<16x128xf32> -> vector<16x128xf32>
    %c0_4 = arith.constant 0 : index
    %c0_5 = arith.constant 0 : index
    %6 = vector.load %arg6[%c0_4, %c0_5] : memref<1x128xf32, #tpu.memory_space<vmem>>, vector<1x128xf32>
    %7 = vector.broadcast %6 : vector<1x128xf32> to vector<16x128xf32>
    %8 = arith.addf %5, %7 : vector<16x128xf32>
    %c0_6 = arith.constant 0 : index
    %c0_7 = arith.constant 0 : index
    %9 = vector.load %arg7[%c0_6, %c0_7] : memref<16x128xf32, #tpu.memory_space<vmem>>, vector<16x128xf32>
    tpu.vector_store %arg7[%c0_6, %c0_7], %8 {strides = array<i32>} : memref<16x128xf32, #tpu.memory_space<vmem>>, vector<16x128xf32>,
    return
  }
  func.func @transform_0(%arg0: i32, %arg1: i32) -> (i32, i32) {
    %c0_i32 = arith.constant 0 : i32
    %c0_i32_0 = arith.constant 0 : i32
    return %arg0, %c0_i32 : i32, i32
  }
  func.func @transform_1(%arg0: i32, %arg1: i32) -> (i32, i32) {
    %c0_i32 = arith.constant 0 : i32
    %c0_i32_0 = arith.constant 0 : i32
    %c0_i32_1 = arith.constant 0 : i32
    return %c0_i32, %c0_i32_0 : i32, i32
  }
  func.func @transform_2(%arg0: i32, %arg1: i32) -> (i32, i32) {
    %c0_i32 = arith.constant 0 : i32
    %c0_i32_0 = arith.constant 0 : i32
    %c0_i32_1 = arith.constant 0 : i32
    return %c0_i32, %c0_i32_0 : i32, i32
  }
  func.func @transform_3(%arg0: i32, %arg1: i32) -> (i32, i32) {
    %c0_i32 = arith.constant 0 : i32
    %c0_i32_0 = arith.constant 0 : i32
    return %c0_i32, %arg1 : i32, i32
  }
  func.func @transform_4(%arg0: i32, %arg1: i32) -> (i32, i32) {
    %c0_i32 = arith.constant 0 : i32
    %c0_i32_0 = arith.constant 0 : i32
    return %c0_i32, %arg1 : i32, i32
  }
  func.func @transform_5(%arg0: i32, %arg1: i32) -> (i32, i32) {
    %c0_i32 = arith.constant 0 : i32
    return %arg0, %arg1 : i32, i32
  }
}

</mosaic_0001>

<bundles_post_ra>
// kernel: tpu_custom_call.1
= control target key start
LH: loop header
LB: loop body
LE: loop exit
PB: predicated region body
PF: predicated region fallthrough
CT: control target
= control target key end

     0   :  { %10 = vsyncpa [#allocation4], 0  ;;  %s591_s0 = inlined_call_operand.hbm [shape: bf16[16,128], index: 0, kind: input, shape index: {}]   ;;  %s592_s1 = inlined_call_operand.hbm [shape: bf16[128,128], index: 1, kind: input, shape index: {}]   ;;  %s593_s2 = inlined_call_operand.vmem [shape: f32[1,128], index: 2, kind: input, shape index: {}]   ;;  %s594_s3 = inlined_call_operand.hbm [shape: bf16[128,128], index: 3, kind: input, shape index: {}]   ;;  %s595_s4 = inlined_call_operand.vmem [shape: f32[1,128], index: 4, kind: input, shape index: {}]   ;;  %s596_s5 = inlined_call_operand.hbm [shape: f32[16,128], index: 5, kind: output, shape index: {}]  }
   0x1   :  { %11 = vsyncpa [#allocation7], 0 }
   0x2   :  { %12 = vsyncpa [#allocation5], 0  ;;  %s30_s20 = sshll.u32 %s592_s1, 4  ;;  %s535_s21 = smov [#allocation6]   ;;  %s31_s20 = int_to_ptr.hbm [resolvable:$true] %s30_s20 }
   0x3   :  { %s32_s22 = sshll.u32 %s535_s21, 4  ;;  %s17_s25 = sshll.u32 %s591_s0, 4  ;;  %s33_s22 = int_to_ptr.vmem [resolvable:$true] %s32_s22  ;;  %s18_s25 = int_to_ptr.hbm [resolvable:$true] %s17_s25 }
   0x4   :  { %s536_s26 = smov 64   ;;  %s537_s27 = smov 4  }
   0x5   :  { %38 = dma.hbm_to_vmem [thread:$0]  %s31_s20, 1024, %s33_s22, [#allocation7], %s536_s26, %s536_s26, %s537_s27  }
   0x6   :  { %s538_s28 = smov [#allocation3]   ;;  %s45_s7 = sshll.u32 %s594_s3, 4  ;;  %s46_s7 = int_to_ptr.hbm [resolvable:$true] %s45_s7 }
   0x7   :  { %s19_s29 = sshll.u32 %s538_s28, 4  ;;  %s539_s1 = smov [#allocation8]   ;;  %s20_s29 = int_to_ptr.vmem [resolvable:$true] %s19_s29 }
   0x8   :  { %25 = dma.hbm_to_vmem [thread:$0]  %s18_s25, 128, %s20_s29, [#allocation4], %s536_s26, %s536_s26, %s537_s27  }
   0x9   :  { %s47_s8 = sshll.u32 %s539_s1, 4  ;;  %s48_s8 = int_to_ptr.vmem [resolvable:$true] %s47_s8 }
   0xa   :  { %53 = dma.hbm_to_vmem [thread:$0]  %s46_s7, 1024, %s48_s8, [#allocation7], %s536_s26, %s536_s26, %s537_s27  }
   0xb   :  { %529 = dma.done.wait [#allocation4], 128  }
   0xc   :  { %530 = vsyncadd [#allocation4], 4294967168 }
   0xd   :  { %531 = dma.done.wait [#allocation7], 2048  }
   0xe   :  { %532 = vsyncadd [#allocation7], 4294965248  ;;  %v400_v0 = vld [vmem:[#allocation6 + $0x38] sm:$0xff]  ;;  %v399_v1 = vld [vmem:[#allocation6 + $0x30] sm:$0xff]  ;;  %s540_s10 = smov [#allocation9]   ;;  %s304_s14 = sshll.u32 %s596_s5, 4  ;;  %s305_s14 = int_to_ptr.hbm [resolvable:$true] %s304_s14 }
   0xf   :  { %148 = vmatpush.bf16.msra.mxu0 %v400_v0  ;;  %v398_v2 = vld [vmem:[#allocation6 + $0x28] sm:$0xff]  ;;  %v397_v3 = vld [vmem:[#allocation6 + $0x20] sm:$0xff]  ;;  %v396_v4 = vld [vmem:[#allocation6 + $0x18] sm:$0xff]  ;;  %s302_s11 = sshll.u32 %s540_s10, 4  ;;  %s541_s15 = smov 128   ;;  %s303_s11 = int_to_ptr.vmem [resolvable:$true] %s302_s11 }
  0x10   :  { %v395_v5 = vld [vmem:[#allocation6 + $0x10] sm:$0xff]  ;;  %v394_v6 = vld [vmem:[#allocation6 + $0x8] sm:$0xff]  ;;  %v393_v7 = vld [vmem:[#allocation6] sm:$0xff]  ;;  %s542_s16 = smov 8  }
  0x11   :  { %v392_v8 = vld [vmem:[#allocation3] sm:$0xff]  ;;  %v408_v10 = vld [vmem:[#allocation8 + $0x30] sm:$0xff]  ;;  %v407_v11 = vld [vmem:[#allocation8 + $0x28] sm:$0xff] }
  0x12   :  { %v409_v9 = vld [vmem:[#allocation8 + $0x38] sm:$0xff]  ;;  %v423_v12 = vld [vmem:[%s593_s2] ss:$0 sm:$0xff]  ;;  %v406_v13 = vld [vmem:[#allocation8 + $0x20] sm:$0xff] }
  0x13   :  { %149 = vmatpush.bf16.msra.mxu0 %v399_v1  ;;  %282 = vmatpush.bf16.msra.mxu1 %v409_v9  ;;  %v405_v17 = vld [vmem:[#allocation8 + $0x18] sm:$0xff]  ;;  %v404_v18 = vld [vmem:[#allocation8 + $0x10] sm:$0xff]  ;;  %v403_v23 = vld [vmem:[#allocation8 + $0x8] sm:$0xff] }
  0x14   :  { %v402_v25 = vld [vmem:[#allocation8] sm:$0xff]  ;;  %v424_v52 = vld [vmem:[%s595_s4] ss:$0 sm:$0xff] }
  0x17   :  { %150 = vmatpush.bf16.msra.mxu0 %v398_v2  ;;  %283 = vmatpush.bf16.msra.mxu1 %v408_v10 }
  0x1b   :  { %151 = vmatpush.bf16.msra.mxu0 %v397_v3  ;;  %284 = vmatpush.bf16.msra.mxu1 %v407_v11 }
  0x1f   :  { %152 = vmatpush.bf16.msra.mxu0 %v396_v4  ;;  %285 = vmatpush.bf16.msra.mxu1 %v406_v13 }
  0x23   :  { %153 = vmatpush.bf16.msra.mxu0 %v395_v5  ;;  %286 = vmatpush.bf16.msra.mxu1 %v405_v17 }
  0x27   :  { %154 = vmatpush.bf16.msra.mxu0 %v394_v6  ;;  %287 = vmatpush.bf16.msra.mxu1 %v404_v18 }
  0x2b   :  { %155 = vmatpush.bf16.msra.mxu0 %v393_v7  ;;  %288 = vmatpush.bf16.msra.mxu1 %v403_v23 }
  0x2e   :  { %156 = vmatmul.bf16.vlgmr.msra.gmra.mxu0 %v392_v8 }
  0x2f   :  { %289 = vmatpush.bf16.msra.mxu1 %v402_v25 }
  0xab   :  { %v157_v14 = vpop.f32.mrf.mxu0 }
  0xac   :  { %v158_v15 = vadd.f32 %v423_v12, %v157_v14 }
  0xae   :  { %v354_v16 = vmul.f32 -1.442695, %v158_v15 }
  0xb0   :  { %425 = vpow2.f32 %v354_v16 }
  0xb3   :  { %v159_v19 = vpop.f32.mrf.mxu0 }
  0xb4   :  { %v160_v20 = vadd.f32 %v423_v12, %v159_v19 }
  0xb6   :  { %v426_v21 = vpop.eup %425  ;;  %v355_v22 = vmul.f32 -1.442695, %v160_v20 }
  0xb7   :  { %v168_v24 = vadd.f32 1.0, %v426_v21 }
  0xb8   :  { %427 = vpow2.f32 %v355_v22 }
  0xb9   :  { %429 = vrcp.f32 %v168_v24  ;;  %v181_v35 = vand.u32 2147483648, %v168_v24  ;;  %vm175_vm1 = vweird.f32 %v168_v24  ;;  %v179_v36 = vand.u32 2147483647, %v168_v24 }
  0xbb   :  { %v182_v42 = vor.u32 1.1754944e-38, %v181_v35  ;;  %vm180_vm4 = vcmp.eq.f32.partialorder %v179_v36, 8.507059e+37 }
  0xbe   :  { %v428_v26 = vpop.eup %427 }
  0xbf   :  { %v430_v27 = vpop.eup %429  ;;  %v169_v28 = vadd.f32 1.0, %v428_v26 }
  0xc0   :  { %v171_v29 = vmul.f32 %v430_v27, %v168_v24  ;;  %vm176_vm0 = vweird.f32 %v430_v27 }
  0xc1   :  { %431 = vrcp.f32 %v169_v28  ;;  %vm177_vm2 = vmor %vm175_vm1, %vm176_vm0  ;;  %v196_v38 = vand.u32 2147483648, %v169_v28  ;;  %v194_v41 = vand.u32 2147483647, %v169_v28  ;;  %vm190_vm5 = vweird.f32 %v169_v28 }
  0xc2   :  { %v172_v30 = vsub.f32 1.0, %v171_v29 }
  0xc3   :  { %v197_v45 = vor.u32 1.1754944e-38, %v196_v38  ;;  %vm195_vm7 = vcmp.eq.f32.partialorder %v194_v41, 8.507059e+37 }
  0xc4   :  { %v173_v31 = vmul.f32 %v430_v27, %v172_v30 }
  0xc6   :  { %v174_v33 = vadd.f32 %v430_v27, %v173_v31 }
  0xc7   :  { %v432_v32 = vpop.eup %431 }
  0xc8   :  { %v186_v34 = vmul.f32 %v432_v32, %v169_v28  ;;  %v178_v39 = vsel %vm177_vm2, %v430_v27, %v174_v33  ;;  %vm191_vm3 = vweird.f32 %v432_v32 }
  0xc9   :  { %v183_v44 = vsel %vm180_vm4, %v182_v42, %v178_v39  ;;  %vm192_vm6 = vmor %vm190_vm5, %vm191_vm3 }
  0xca   :  { %v187_v37 = vsub.f32 1.0, %v186_v34  ;;  %v200_v48 = vmul.f32 %v183_v44, %v158_v15 }
  0xcc   :  { %v188_v40 = vmul.f32 %v432_v32, %v187_v37 }
  0xce   :  { %v189_v43 = vadd.f32 %v432_v32, %v188_v40 }
  0xd0   :  { %v193_v46 = vsel %vm192_vm6, %v432_v32, %v189_v43 }
  0xd1   :  { %v198_v47 = vsel %vm195_vm7, %v197_v45, %v193_v46 }
  0xd2   :  { %v201_v49 = vmul.f32 %v198_v47, %v160_v20 }
  0xd4   :  { %v413_v50 = vpack.c.bf16 %v201_v49, %v200_v48 }
  0xd6   :  { %414 = vst [vmem:[#allocation2] sm:$0xff] %v413_v50  }
  0xdd   :  { %v401_v51 = vld [vmem:[#allocation2] sm:$0xff] }
  0xde   :  { %290 = vmatmul.bf16.vlgmr.msra.gmra.mxu1 %v401_v51 }
 0x15b   :  { %v291_v53 = vpop.f32.mrf.mxu1 }
 0x15c   :  { %v292_v54 = vadd.f32 %v424_v52, %v291_v53 }
 0x15e   :  { %296 = vst [vmem:[#allocation9] sm:$0xff] %v292_v54 }
 0x163   :  { %v293_v55 = vpop.f32.mrf.mxu1 }
 0x164   :  { %v294_v56 = vadd.f32 %v424_v52, %v293_v55 }
 0x166   :  { %297 = vst [vmem:[#allocation9 + $0x8] sm:$0xff] %v294_v56 }
 0x167   :  { %310 = dma.vmem_to_hbm [thread:$0]  %s303_s11, 256, %s305_s14, [#allocation5], %s541_s15, %s541_s15, %s542_s16  }
 0x168   :  { %533 = dma.done.wait [#allocation5], 256  }
 0x169   :  { %534 = vsyncadd [#allocation5], 4294967040 }
 0x16a   :  { %315 = vsyncpa [#allocation4], 1 }
 0x16b   :  { %316 = vsyncpa [#allocation7], 1 }
 0x16c   :  { %317 = vsyncpa [#allocation5], 1 }

// kernel: tpu_custom_call.1
= control target key start
LH: loop header
LB: loop body
LE: loop exit
PB: predicated region body
PF: predicated region fallthrough
CT: control target
= control target key end

     0   :  { %10 = vsyncpa [#allocation4], 0  ;;  %s591_s0 = inlined_call_operand.hbm [shape: bf16[16,128], index: 0, kind: input, shape index: {}]   ;;  %s592_s1 = inlined_call_operand.hbm [shape: bf16[128,128], index: 1, kind: input, shape index: {}]   ;;  %s593_s2 = inlined_call_operand.vmem [shape: f32[1,128], index: 2, kind: input, shape index: {}]   ;;  %s594_s3 = inlined_call_operand.hbm [shape: bf16[128,128], index: 3, kind: input, shape index: {}]   ;;  %s595_s4 = inlined_call_operand.vmem [shape: f32[1,128], index: 4, kind: input, shape index: {}]   ;;  %s596_s5 = inlined_call_operand.hbm [shape: f32[16,128], index: 5, kind: output, shape index: {}]  }
   0x1   :  { %11 = vsyncpa [#allocation7], 0 }
   0x2   :  { %12 = vsyncpa [#allocation5], 0  ;;  %s30_s20 = sshll.u32 %s592_s1, 4  ;;  %s535_s21 = smov [#allocation6]   ;;  %s31_s20 = int_to_ptr.hbm [resolvable:$true] %s30_s20 }
   0x3   :  { %s32_s22 = sshll.u32 %s535_s21, 4  ;;  %s17_s25 = sshll.u32 %s591_s0, 4  ;;  %s33_s22 = int_to_ptr.vmem [resolvable:$true] %s32_s22  ;;  %s18_s25 = int_to_ptr.hbm [resolvable:$true] %s17_s25 }
   0x4   :  { %s536_s26 = smov 64   ;;  %s537_s27 = smov 4  }
   0x5   :  { %38 = dma.hbm_to_vmem [thread:$0]  %s31_s20, 1024, %s33_s22, [#allocation7], %s536_s26, %s536_s26, %s537_s27  }
   0x6   :  { %s538_s28 = smov [#allocation3]   ;;  %s45_s7 = sshll.u32 %s594_s3, 4  ;;  %s46_s7 = int_to_ptr.hbm [resolvable:$true] %s45_s7 }
   0x7   :  { %s19_s29 = sshll.u32 %s538_s28, 4  ;;  %s539_s1 = smov [#allocation8]   ;;  %s20_s29 = int_to_ptr.vmem [resolvable:$true] %s19_s29 }
   0x8   :  { %25 = dma.hbm_to_vmem [thread:$0]  %s18_s25, 128, %s20_s29, [#allocation4], %s536_s26, %s536_s26, %s537_s27  }
   0x9   :  { %s47_s8 = sshll.u32 %s539_s1, 4  ;;  %s48_s8 = int_to_ptr.vmem [resolvable:$true] %s47_s8 }
   0xa   :  { %53 = dma.hbm_to_vmem [thread:$0]  %s46_s7, 1024, %s48_s8, [#allocation7], %s536_s26, %s536_s26, %s537_s27  }
   0xb   :  { %529 = dma.done.wait [#allocation4], 128  }
   0xc   :  { %530 = vsyncadd [#allocation4], 4294967168 }
   0xd   :  { %531 = dma.done.wait [#allocation7], 2048  }
   0xe   :  { %532 = vsyncadd [#allocation7], 4294965248  ;;  %v400_v0 = vld [vmem:[#allocation6 + $0x38] sm:$0xff]  ;;  %v399_v1 = vld [vmem:[#allocation6 + $0x30] sm:$0xff]  ;;  %s540_s10 = smov [#allocation9]   ;;  %s304_s14 = sshll.u32 %s596_s5, 4  ;;  %s305_s14 = int_to_ptr.hbm [resolvable:$true] %s304_s14 }
   0xf   :  { %148 = vmatpush.bf16.msra.mxu0 %v400_v0  ;;  %v398_v2 = vld [vmem:[#allocation6 + $0x28] sm:$0xff]  ;;  %v397_v3 = vld [vmem:[#allocation6 + $0x20] sm:$0xff]  ;;  %v396_v4 = vld [vmem:[#allocation6 + $0x18] sm:$0xff]  ;;  %s302_s11 = sshll.u32 %s540_s10, 4  ;;  %s541_s15 = smov 128   ;;  %s303_s11 = int_to_ptr.vmem [resolvable:$true] %s302_s11 }
  0x10   :  { %v395_v5 = vld [vmem:[#allocation6 + $0x10] sm:$0xff]  ;;  %v394_v6 = vld [vmem:[#allocation6 + $0x8] sm:$0xff]  ;;  %v393_v7 = vld [vmem:[#allocation6] sm:$0xff]  ;;  %s542_s16 = smov 8  }
  0x11   :  { %v392_v8 = vld [vmem:[#allocation3] sm:$0xff]  ;;  %v408_v10 = vld [vmem:[#allocation8 + $0x30] sm:$0xff]  ;;  %v407_v11 = vld [vmem:[#allocation8 + $0x28] sm:$0xff] }
  0x12   :  { %v409_v9 = vld [vmem:[#allocation8 + $0x38] sm:$0xff]  ;;  %v423_v12 = vld [vmem:[%s593_s2] ss:$0 sm:$0xff]  ;;  %v406_v13 = vld [vmem:[#allocation8 + $0x20] sm:$0xff] }
  0x13   :  { %149 = vmatpush.bf16.msra.mxu0 %v399_v1  ;;  %282 = vmatpush.bf16.msra.mxu1 %v409_v9  ;;  %v405_v17 = vld [vmem:[#allocation8 + $0x18] sm:$0xff]  ;;  %v404_v18 = vld [vmem:[#allocation8 + $0x10] sm:$0xff]  ;;  %v403_v23 = vld [vmem:[#allocation8 + $0x8] sm:$0xff] }
  0x14   :  { %v402_v25 = vld [vmem:[#allocation8] sm:$0xff]  ;;  %v424_v52 = vld [vmem:[%s595_s4] ss:$0 sm:$0xff] }
  0x17   :  { %150 = vmatpush.bf16.msra.mxu0 %v398_v2  ;;  %283 = vmatpush.bf16.msra.mxu1 %v408_v10 }
  0x1b   :  { %151 = vmatpush.bf16.msra.mxu0 %v397_v3  ;;  %284 = vmatpush.bf16.msra.mxu1 %v407_v11 }
  0x1f   :  { %152 = vmatpush.bf16.msra.mxu0 %v396_v4  ;;  %285 = vmatpush.bf16.msra.mxu1 %v406_v13 }
  0x23   :  { %153 = vmatpush.bf16.msra.mxu0 %v395_v5  ;;  %286 = vmatpush.bf16.msra.mxu1 %v405_v17 }
  0x27   :  { %154 = vmatpush.bf16.msra.mxu0 %v394_v6  ;;  %287 = vmatpush.bf16.msra.mxu1 %v404_v18 }
  0x2b   :  { %155 = vmatpush.bf16.msra.mxu0 %v393_v7  ;;  %288 = vmatpush.bf16.msra.mxu1 %v403_v23 }
  0x2e   :  { %156 = vmatmul.bf16.vlgmr.msra.gmra.mxu0 %v392_v8 }
  0x2f   :  { %289 = vmatpush.bf16.msra.mxu1 %v402_v25 }
  0xab   :  { %v157_v14 = vpop.f32.mrf.mxu0 }
  0xac   :  { %v158_v15 = vadd.f32 %v423_v12, %v157_v14 }
  0xae   :  { %v354_v16 = vmul.f32 -1.442695, %v158_v15 }
  0xb0   :  { %425 = vpow2.f32 %v354_v16 }
  0xb3   :  { %v159_v19 = vpop.f32.mrf.mxu0 }
  0xb4   :  { %v160_v20 = vadd.f32 %v423_v12, %v159_v19 }
  0xb6   :  { %v426_v21 = vpop.eup %425  ;;  %v355_v22 = vmul.f32 -1.442695, %v160_v20 }
  0xb7   :  { %v168_v24 = vadd.f32 1.0, %v426_v21 }
  0xb8   :  { %427 = vpow2.f32 %v355_v22 }
  0xb9   :  { %429 = vrcp.f32 %v168_v24  ;;  %v181_v35 = vand.u32 2147483648, %v168_v24  ;;  %vm175_vm1 = vweird.f32 %v168_v24  ;;  %v179_v36 = vand.u32 2147483647, %v168_v24 }
  0xbb   :  { %v182_v42 = vor.u32 1.1754944e-38, %v181_v35  ;;  %vm180_vm4 = vcmp.eq.f32.partialorder %v179_v36, 8.507059e+37 }
  0xbe   :  { %v428_v26 = vpop.eup %427 }
  0xbf   :  { %v430_v27 = vpop.eup %429  ;;  %v169_v28 = vadd.f32 1.0, %v428_v26 }
  0xc0   :  { %v171_v29 = vmul.f32 %v430_v27, %v168_v24  ;;  %vm176_vm0 = vweird.f32 %v430_v27 }
  0xc1   :  { %431 = vrcp.f32 %v169_v28  ;;  %vm177_vm2 = vmor %vm175_vm1, %vm176_vm0  ;;  %v196_v38 = vand.u32 2147483648, %v169_v28  ;;  %v194_v41 = vand.u32 2147483647, %v169_v28  ;;  %vm190_vm5 = vweird.f32 %v169_v28 }
  0xc2   :  { %v172_v30 = vsub.f32 1.0, %v171_v29 }
  0xc3   :  { %v197_v45 = vor.u32 1.1754944e-38, %v196_v38  ;;  %vm195_vm7 = vcmp.eq.f32.partialorder %v194_v41, 8.507059e+37 }
  0xc4   :  { %v173_v31 = vmul.f32 %v430_v27, %v172_v30 }
  0xc6   :  { %v174_v33 = vadd.f32 %v430_v27, %v173_v31 }
  0xc7   :  { %v432_v32 = vpop.eup %431 }
  0xc8   :  { %v186_v34 = vmul.f32 %v432_v32, %v169_v28  ;;  %v178_v39 = vsel %vm177_vm2, %v430_v27, %v174_v33  ;;  %vm191_vm3 = vweird.f32 %v432_v32 }
  0xc9   :  { %v183_v44 = vsel %vm180_vm4, %v182_v42, %v178_v39  ;;  %vm192_vm6 = vmor %vm190_vm5, %vm191_vm3 }
  0xca   :  { %v187_v37 = vsub.f32 1.0, %v186_v34  ;;  %v200_v48 = vmul.f32 %v183_v44, %v158_v15 }
  0xcc   :  { %v188_v40 = vmul.f32 %v432_v32, %v187_v37 }
  0xce   :  { %v189_v43 = vadd.f32 %v432_v32, %v188_v40 }
  0xd0   :  { %v193_v46 = vsel %vm192_vm6, %v432_v32, %v189_v43 }
  0xd1   :  { %v198_v47 = vsel %vm195_vm7, %v197_v45, %v193_v46 }
  0xd2   :  { %v201_v49 = vmul.f32 %v198_v47, %v160_v20 }
  0xd4   :  { %v413_v50 = vpack.c.bf16 %v201_v49, %v200_v48 }
  0xd6   :  { %414 = vst [vmem:[#allocation2] sm:$0xff] %v413_v50  }
  0xdd   :  { %v401_v51 = vld [vmem:[#allocation2] sm:$0xff] }
  0xde   :  { %290 = vmatmul.bf16.vlgmr.msra.gmra.mxu1 %v401_v51 }
 0x15b   :  { %v291_v53 = vpop.f32.mrf.mxu1 }
 0x15c   :  { %v292_v54 = vadd.f32 %v424_v52, %v291_v53 }
 0x15e   :  { %296 = vst [vmem:[#allocation9] sm:$0xff] %v292_v54 }
 0x163   :  { %v293_v55 = vpop.f32.mrf.mxu1 }
 0x164   :  { %v294_v56 = vadd.f32 %v424_v52, %v293_v55 }
 0x166   :  { %297 = vst [vmem:[#allocation9 + $0x8] sm:$0xff] %v294_v56 }
 0x167   :  { %310 = dma.vmem_to_hbm [thread:$0]  %s303_s11, 256, %s305_s14, [#allocation5], %s541_s15, %s541_s15, %s542_s16  }
 0x168   :  { %533 = dma.done.wait [#allocation5], 256  }
 0x169   :  { %534 = vsyncadd [#allocation5], 4294967040 }
 0x16a   :  { %315 = vsyncpa [#allocation4], 1 }
 0x16b   :  { %316 = vsyncpa [#allocation7], 1 }
 0x16c   :  { %317 = vsyncpa [#allocation5], 1 }

</bundles_post_ra>
